<compile_context>
chip_gen: v7x
topology: tpu7x:2x2x1
jax: 0.10.0
libtpu: 0.0.40
codegen_flags: <defaults>
</compile_context>

<pallas_src>
import jax
import jax.numpy as jnp
from jax import lax
from jax.experimental import pallas as pl
from jax.experimental.pallas import tpu as pltpu


def _softmax_lane(x, scale=1.0, approx=True):
    """Stable softmax over the last (lane) axis, batched over leading dims.
    `scale` is folded into the reciprocal; `approx=True` uses the EUP
    approximate reciprocal (separate issue slot, nearly free)."""
    m = jnp.max(x, axis=-1, keepdims=True)
    e = jnp.exp(x - m)
    s = jnp.sum(e, axis=-1, keepdims=True)
    inv = pl.reciprocal(s, approx=approx)
    if scale != 1.0:
        inv = inv * jnp.float32(scale)
    return e * inv


def _vmem_capacity_bytes(default=64 << 20):
    """Physical VMEM of the attached TPU; conservative 64 MiB (v7x) fallback."""
    try:
        return int(pltpu.get_tpu_info().vmem_capacity_bytes)
    except Exception:
        return default


def _pick_batch_tile(B, C, Cp, HW, vmem_cap, itemsize=4):
    """Batch elements per grid step.  Bigger tiles amortize the ~0.35us/step
    overhead (dominant for this small, mem-bound layer); no forced >=2-steps
    constraint (single-TC v5e/v6e gain nothing from extra steps).  Capped at 16
    to bound the unrolled in-kernel loops.  On v7x one may prefer an even
    number of grid steps so both TensorCores get equal work."""
    # per-element footprint: double-buffered x/out blocks (4*C), fused-conv
    # scratch (3*Cp) and ~6 live (Cp, HW) f32 softmax temporaries.
    per_b = (4 * C + 9 * Cp) * HW * itemsize
    budget = min(vmem_cap // 3, 40 << 20)
    bt = max(1, min(B, budget // max(per_b, 1)))
    bt = min(bt, 16)
    while B % bt:                     # keep the grid evenly tiled
        bt -= 1
    return bt


def attention_layer(x_nchw, wa, ba, wb, bb, wv, bv):
    """x_nchw: (B, C, H, W) f32; w*: (C, C); b*: (C,).  Returns (B, C, H, W)."""
    B, C, H, W = x_nchw.shape
    HW = H * W
    Cp = ((C + 7) // 8) * 8          # tile-aligned height of each A/B/V section
    need_row_mask = Cp != C
    inv_hw = 1.0 / HW

    x = x_nchw.reshape(B, C, HW)

    # Fuse the three 1x1-conv weights/biases; pad each section's output rows to
    # Cp with zeros so in-kernel slices are (8,128)-tile aligned.
    def _pad_rows(w, b):
        if not need_row_mask:
            return w, b
        return (jnp.zeros((Cp, C), w.dtype).at[:C, :].set(w),
                jnp.zeros((Cp,), b.dtype).at[:C].set(b))

    wa_p, ba_p = _pad_rows(wa, ba)
    wb_p, bb_p = _pad_rows(wb, bb)
    wv_p, bv_p = _pad_rows(wv, bv)
    w3 = jnp.concatenate([wa_p, wb_p, wv_p], axis=0)                      # (3Cp, C)
    b3 = jnp.concatenate([ba_p, bb_p, bv_p], axis=0).reshape(3 * Cp, 1)   # (3Cp, 1)

    vmem_cap = _vmem_capacity_bytes()
    Bt = _pick_batch_tile(B, C, Cp, HW, vmem_cap)

    def kernel(x_ref, w3_ref, b3_ref, o_ref, maps_ref):
        w3k = w3_ref[...]                          # (3Cp, C)  hot across the tile
        b3k = b3_ref[...]                          # (3Cp, 1)

        # Phase 1: fused A/B/V 1x1 convs -- one MXU push per batch element,
        # staged to VMEM scratch so the VALU phase below runs batched.
        # (A single (3Cp, C)@(C, Bt*HW) push would need a rank-2 x rank-3
        # dot_general / lane<->sublane reshape that Mosaic can't lower cleanly.)
        def conv_body(b, carry):
            maps_ref[b] = jnp.dot(w3k, x_ref[b],
                                  preferred_element_type=jnp.float32)
            return carry
        lax.fori_loop(0, Bt, conv_body, 0, unroll=True)

        # Phase 2: bias + both softmaxes, batched over the whole tile (single
        # bias broadcast / exp / reduce chain instead of Bt copies).
        maps = maps_ref[...] + b3k[None, :, :]     # (Bt, 3Cp, HW)
        a_map = maps[:, :Cp, :]                    # tile-aligned section views
        b_map = maps[:, Cp:2 * Cp, :]
        v_map = maps[:, 2 * Cp:, :]

        # 1/HW mean folded into soft_b; exact reciprocal on the G path (its
        # error would pass through two more matmuls), approx on the output path.
        soft_b = _softmax_lane(b_map, scale=inv_hw, approx=False)
        soft_v = _softmax_lane(v_map, approx=True)

        if need_row_mask:
            # Padded channel rows of soft_v are uniform (not zero) after the
            # softmax; zero them so the i-contraction below ignores them.
            row = lax.broadcasted_iota(jnp.int32, (Cp, HW), 0)
            soft_v = jnp.where((row < C)[None], soft_v, jnp.float32(0.0))

        # Phase 3: per-element double-attention contractions (tiny 2D MXU
        # matmuls; static indices -> free views, per-iteration temps are small).
        for b in range(Bt):
            # gt[j, i] = sum_n A[j, n] * softB[i, n] / HW   (== G[i, j])
            gt = lax.dot_general(a_map[b], soft_b[b],
                                 dimension_numbers=(((1,), (1,)), ((), ())),
                                 preferred_element_type=jnp.float32)   # (Cp, Cp)
            # out[j, n] = sum_i G[i, j] * softV[i, n]
            outb = jnp.dot(gt, soft_v[b], preferred_element_type=jnp.float32)
            o_ref[b] = outb[:C, :].astype(o_ref.dtype)

    # Explicit scoped-VMEM limit (v5e default is only 16 MiB; v7x physical 64).
    blk = Bt * C * HW * 4
    scratch = Bt * 3 * Cp * HW * 4
    temps = 6 * Bt * Cp * HW * 4
    w_bytes = 3 * Cp * (C + 1) * 4
    need = 2 * (2 * blk) + scratch + temps + 2 * w_bytes
    vmem_limit = int(min(max(int(need * 1.5) + (8 << 20), 24 << 20),
                         (vmem_cap * 3) // 4))

    out = pl.pallas_call(
        kernel,
        out_shape=jax.ShapeDtypeStruct((B, C, HW), x.dtype),
        grid_spec=pltpu.PrefetchScalarGridSpec(
            num_scalar_prefetch=0,
            grid=(B // Bt,),
            in_specs=[
                pl.BlockSpec((Bt, C, HW), lambda i: (i, 0, 0)),   # x
                pl.BlockSpec((3 * Cp, C), lambda i: (0, 0)),      # fused weight
                pl.BlockSpec((3 * Cp, 1), lambda i: (0, 0)),      # fused bias
            ],
            out_specs=pl.BlockSpec((Bt, C, HW), lambda i: (i, 0, 0)),
            scratch_shapes=[pltpu.VMEM((Bt, 3 * Cp, HW), jnp.float32)],
        ),
        compiler_params=pltpu.CompilerParams(
            dimension_semantics=("parallel",),
            vmem_limit_bytes=vmem_limit),
    )(x, w3, b3)

    return out.reshape(B, C, H, W)


def _reference(x_nchw, wa, ba, wb, bb, wv, bv):
    """Pure-JAX reference mirroring the PyTorch forward exactly."""
    B, C, H, W = x_nchw.shape
    HW = H * W
    x = x_nchw.reshape(B, C, HW)
    A = jnp.einsum('oc,bcn->bon', wa, x) + ba[None, :, None]
    Bm = jnp.einsum('oc,bcn->bon', wb, x) + bb[None, :, None]
    V = jnp.einsum('oc,bcn->bon', wv, x) + bv[None, :, None]
    fmaps = A[:, None, :, :]                            # (B,1,C,HW)
    amap = jax.nn.softmax(Bm, axis=-1)[:, :, None, :]   # (B,C,1,HW)
    G = jnp.mean(fmaps * amap, axis=-1)                 # (B,C,C)
    av = jax.nn.softmax(V, axis=-1)                     # (B,C,HW)
    out = jnp.einsum('bin,bij->bjn', av, G)             # (B,C,HW)
    return out.reshape(B, C, H, W)


if __name__ == "__main__":
    B, C, H, W = 2, 4, 16, 16
    key = jax.random.PRNGKey(0)
    kx, ka, kb, kv, kba, kbb, kbv = jax.random.split(key, 7)

    x = jax.random.normal(kx, (B, C, H, W), dtype=jnp.float32)
    # 1x1 conv params (weight (C,C), bias (C,)), PyTorch-style fan-in scale.
    bound = 1.0 / (C ** 0.5)
    wa = jax.random.uniform(ka, (C, C), jnp.float32, -bound, bound)
    wb = jax.random.uniform(kb, (C, C), jnp.float32, -bound, bound)
    wv = jax.random.uniform(kv, (C, C), jnp.float32, -bound, bound)
    ba = jax.random.uniform(kba, (C,), jnp.float32, -bound, bound)
    bb = jax.random.uniform(kbb, (C,), jnp.float32, -bound, bound)
    bv = jax.random.uniform(kbv, (C,), jnp.float32, -bound, bound)

    out = attention_layer(x, wa, ba, wb, bb, wv, bv)
    out = jax.block_until_ready(out)

    ref = _reference(x, wa, ba, wb, bb, wv, bv)
    assert out.shape == (B, C, H, W)
    # tolerance slightly loosened for the EUP approximate-reciprocal softmax
    assert jnp.allclose(out, ref, atol=1e-4, rtol=2e-3), "mismatch vs reference"

    print("KERNEL_OK")
</pallas_src>

<mosaic_0001>
module attributes {stable_mosaic.version = 11 : i64} {
  func.func @kernel(%arg0: i32, %arg1: memref<2x4x256xf32, #tpu.memory_space<vmem>>, %arg2: memref<24x4xf32, #tpu.memory_space<vmem>>, %arg3: memref<24x1xf32, #tpu.memory_space<vmem>>, %arg4: memref<2x4x256xf32, #tpu.memory_space<vmem>>, %arg5: memref<2x24x256xf32, #tpu.memory_space<vmem>>) attributes {dimension_semantics = [#tpu.dimension_semantics<parallel>], iteration_bounds = array<i64: 1>, scalar_prefetch = 0 : i64, scratch_operands = 1 : i64, tpu.core_type = #tpu.core_type<tc>, window_params = [{transform_indices = @transform_0, window_bounds = array<i64: 2, 4, 256>}, {pipeline_mode = #tpu.pipeline_mode<synchronous>, transform_indices = @transform_1, window_bounds = array<i64: 24, 4>}, {pipeline_mode = #tpu.pipeline_mode<synchronous>, transform_indices = @transform_2, window_bounds = array<i64: 24, 1>}, {transform_indices = @transform_3, window_bounds = array<i64: 2, 4, 256>}]} {
    %c0 = arith.constant 0 : index
    %c0_0 = arith.constant 0 : index
    %0 = vector.load %arg2[%c0, %c0_0] : memref<24x4xf32, #tpu.memory_space<vmem>>, vector<24x4xf32>
    %c0_1 = arith.constant 0 : index
    %c0_2 = arith.constant 0 : index
    %1 = vector.load %arg3[%c0_1, %c0_2] : memref<24x1xf32, #tpu.memory_space<vmem>>, vector<24x1xf32>
    %c0_i32 = arith.constant 0 : i32
    %2 = arith.index_cast %c0_i32 : i32 to index
    %c0_3 = arith.constant 0 : index
    %c0_4 = arith.constant 0 : index
    %3 = vector.load %arg1[%2, %c0_3, %c0_4] : memref<2x4x256xf32, #tpu.memory_space<vmem>>, vector<1x4x256xf32>
    %4 = vector.shape_cast %3 : vector<1x4x256xf32> to vector<4x256xf32>
    %cst = arith.constant dense<0.000000e+00> : vector<24x256xf32>
    %5 = tpu.matmul %0, %4, %cst {dimension_numbers = #tpu.dot_dimension_numbers<[1], [0], [0], [1], [0, 0, 1, 1], [], []>} : vector<24x4xf32>, vector<4x256xf32>, vector<24x256xf32> -> vector<24x256xf32>
    %6 = arith.index_cast %c0_i32 : i32 to index
    %c0_5 = arith.constant 0 : index
    %c0_6 = arith.constant 0 : index
    %7 = vector.load %arg5[%6, %c0_5, %c0_6] : memref<2x24x256xf32, #tpu.memory_space<vmem>>, vector<1x24x256xf32>
    %8 = vector.shape_cast %7 : vector<1x24x256xf32> to vector<24x256xf32>
    %9 = vector.shape_cast %5 : vector<24x256xf32> to vector<1x24x256xf32>
    tpu.vector_store %arg5[%6, %c0_5, %c0_6], %9 {strides = array<i32>} : memref<2x24x256xf32, #tpu.memory_space<vmem>>, vector<1x24x256xf32>,
    %c1_i32 = arith.constant 1 : i32
    %10 = arith.index_cast %c1_i32 : i32 to index
    %c0_7 = arith.constant 0 : index
    %c0_8 = arith.constant 0 : index
    %11 = vector.load %arg1[%10, %c0_7, %c0_8] : memref<2x4x256xf32, #tpu.memory_space<vmem>>, vector<1x4x256xf32>
    %12 = vector.shape_cast %11 : vector<1x4x256xf32> to vector<4x256xf32>
    %cst_9 = arith.constant dense<0.000000e+00> : vector<24x256xf32>
    %13 = tpu.matmul %0, %12, %cst_9 {dimension_numbers = #tpu.dot_dimension_numbers<[1], [0], [0], [1], [0, 0, 1, 1], [], []>} : vector<24x4xf32>, vector<4x256xf32>, vector<24x256xf32> -> vector<24x256xf32>
    %14 = arith.index_cast %c1_i32 : i32 to index
    %c0_10 = arith.constant 0 : index
    %c0_11 = arith.constant 0 : index
    %15 = vector.load %arg5[%14, %c0_10, %c0_11] : memref<2x24x256xf32, #tpu.memory_space<vmem>>, vector<1x24x256xf32>
    %16 = vector.shape_cast %15 : vector<1x24x256xf32> to vector<24x256xf32>
    %17 = vector.shape_cast %13 : vector<24x256xf32> to vector<1x24x256xf32>
    tpu.vector_store %arg5[%14, %c0_10, %c0_11], %17 {strides = array<i32>} : memref<2x24x256xf32, #tpu.memory_space<vmem>>, vector<1x24x256xf32>,
    %c2_i32 = arith.constant 2 : i32
    %c0_12 = arith.constant 0 : index
    %c0_13 = arith.constant 0 : index
    %c0_14 = arith.constant 0 : index
    %18 = vector.load %arg5[%c0_12, %c0_13, %c0_14] : memref<2x24x256xf32, #tpu.memory_space<vmem>>, vector<2x24x256xf32>
    %19 = vector.shape_cast %1 : vector<24x1xf32> to vector<1x24x1xf32>
    %20 = vector.broadcast %19 : vector<1x24x1xf32> to vector<2x24x256xf32>
    %21 = arith.addf %18, %20 : vector<2x24x256xf32>
    %22 = vector.extract_strided_slice %21 {offsets = [0, 0, 0], sizes = [2, 8, 256], strides = [1, 1, 1]} : vector<2x24x256xf32> to vector<2x8x256xf32>
    %23 = vector.extract_strided_slice %21 {offsets = [0, 8, 0], sizes = [2, 8, 256], strides = [1, 1, 1]} : vector<2x24x256xf32> to vector<2x8x256xf32>
    %24 = vector.extract_strided_slice %21 {offsets = [0, 16, 0], sizes = [2, 8, 256], strides = [1, 1, 1]} : vector<2x24x256xf32> to vector<2x8x256xf32>
    %cst_15 = arith.constant dense<0xFF800000> : vector<2x8xf32>
    %25 = vector.multi_reduction <maximumf>, %23, %cst_15 [2] : vector<2x8x256xf32> to vector<2x8xf32>
    %26 = vector.shape_cast %25 : vector<2x8xf32> to vector<2x8x1xf32>
    %27 = vector.broadcast %26 : vector<2x8x1xf32> to vector<2x8x256xf32>
    %28 = arith.subf %23, %27 : vector<2x8x256xf32>
    %29 = math.exp %28 : vector<2x8x256xf32>
    %cst_16 = arith.constant dense<0.000000e+00> : vector<2x8xf32>
    %30 = vector.multi_reduction <add>, %29, %cst_16 [2] : vector<2x8x256xf32> to vector<2x8xf32>
    %31 = vector.shape_cast %30 : vector<2x8xf32> to vector<2x8x1xf32>
    %32 = tpu.reciprocal %31 : vector<2x8x1xf32> -> vector<2x8x1xf32>
    %cst_17 = arith.constant 3.906250e-03 : f32
    %33 = vector.broadcast %cst_17 : f32 to vector<2x8x1xf32>
    %34 = arith.mulf %32, %33 : vector<2x8x1xf32>
    %35 = vector.broadcast %34 : vector<2x8x1xf32> to vector<2x8x256xf32>
    %36 = arith.mulf %29, %35 : vector<2x8x256xf32>
    %cst_18 = arith.constant dense<0xFF800000> : vector<2x8xf32>
    %37 = vector.multi_reduction <maximumf>, %24, %cst_18 [2] : vector<2x8x256xf32> to vector<2x8xf32>
    %38 = vector.shape_cast %37 : vector<2x8xf32> to vector<2x8x1xf32>
    %39 = vector.broadcast %38 : vector<2x8x1xf32> to vector<2x8x256xf32>
    %40 = arith.subf %24, %39 : vector<2x8x256xf32>
    %41 = math.exp %40 : vector<2x8x256xf32>
    %cst_19 = arith.constant dense<0.000000e+00> : vector<2x8xf32>
    %42 = vector.multi_reduction <add>, %41, %cst_19 [2] : vector<2x8x256xf32> to vector<2x8xf32>
    %43 = vector.shape_cast %42 : vector<2x8xf32> to vector<2x8x1xf32>
    %44 = tpu.reciprocal %43 {approx = true} : vector<2x8x1xf32> -> vector<2x8x1xf32>
    %45 = vector.broadcast %44 : vector<2x8x1xf32> to vector<2x8x256xf32>
    %46 = arith.mulf %41, %45 : vector<2x8x256xf32>
    %47 = tpu.iota {dimensions = array<i32: 0>} : vector<8x256xi32>
    %c4_i32 = arith.constant 4 : i32
    %48 = vector.broadcast %c4_i32 : i32 to vector<8x256xi32>
    %49 = arith.cmpi slt, %47, %48 : vector<8x256xi32>
    %50 = vector.shape_cast %49 : vector<8x256xi1> to vector<1x8x256xi1>
    %cst_20 = arith.constant 0.000000e+00 : f32
    %51 = vector.shape_cast %50 : vector<1x8x256xi1> to vector<1x8x256xi1>
    %52 = vector.broadcast %51 : vector<1x8x256xi1> to vector<2x8x256xi1>
    %53 = vector.broadcast %cst_20 : f32 to vector<2x8x256xf32>
    %54 = arith.select %52, %46, %53 : vector<2x8x256xi1>, vector<2x8x256xf32>
    %55 = vector.extract_strided_slice %22 {offsets = [0, 0, 0], sizes = [1, 8, 256], strides = [1, 1, 1]} : vector<2x8x256xf32> to vector<1x8x256xf32>
    %56 = vector.shape_cast %55 : vector<1x8x256xf32> to vector<8x256xf32>
    %57 = vector.extract_strided_slice %36 {offsets = [0, 0, 0], sizes = [1, 8, 256], strides = [1, 1, 1]} : vector<2x8x256xf32> to vector<1x8x256xf32>
    %58 = vector.shape_cast %57 : vector<1x8x256xf32> to vector<8x256xf32>
    %cst_21 = arith.constant dense<0.000000e+00> : vector<8x8xf32>
    %59 = tpu.matmul %56, %58, %cst_21 {dimension_numbers = #tpu.dot_dimension_numbers<[1], [1], [0], [0], [0, 0, 1, 0], [], []>} : vector<8x256xf32>, vector<8x256xf32>, vector<8x8xf32> -> vector<8x8xf32>
    %60 = vector.extract_strided_slice %54 {offsets = [0, 0, 0], sizes = [1, 8, 256], strides = [1, 1, 1]} : vector<2x8x256xf32> to vector<1x8x256xf32>
    %61 = vector.shape_cast %60 : vector<1x8x256xf32> to vector<8x256xf32>
    %cst_22 = arith.constant dense<0.000000e+00> : vector<8x256xf32>
    %62 = tpu.matmul %59, %61, %cst_22 {dimension_numbers = #tpu.dot_dimension_numbers<[1], [0], [0], [1], [0, 0, 1, 1], [], []>} : vector<8x8xf32>, vector<8x256xf32>, vector<8x256xf32> -> vector<8x256xf32>
    %63 = vector.extract_strided_slice %62 {offsets = [0, 0], sizes = [4, 256], strides = [1, 1]} : vector<8x256xf32> to vector<4x256xf32>
    %c0_23 = arith.constant 0 : index
    %c0_24 = arith.constant 0 : index
    %c0_25 = arith.constant 0 : index
    %64 = vector.load %arg4[%c0_23, %c0_24, %c0_25] : memref<2x4x256xf32, #tpu.memory_space<vmem>>, vector<1x4x256xf32>
    %65 = vector.shape_cast %64 : vector<1x4x256xf32> to vector<4x256xf32>
    %66 = vector.shape_cast %63 : vector<4x256xf32> to vector<1x4x256xf32>
    tpu.vector_store %arg4[%c0_23, %c0_24, %c0_25], %66 {strides = array<i32>} : memref<2x4x256xf32, #tpu.memory_space<vmem>>, vector<1x4x256xf32>,
    %67 = vector.extract_strided_slice %22 {offsets = [1, 0, 0], sizes = [1, 8, 256], strides = [1, 1, 1]} : vector<2x8x256xf32> to vector<1x8x256xf32>
    %68 = vector.shape_cast %67 : vector<1x8x256xf32> to vector<8x256xf32>
    %69 = vector.extract_strided_slice %36 {offsets = [1, 0, 0], sizes = [1, 8, 256], strides = [1, 1, 1]} : vector<2x8x256xf32> to vector<1x8x256xf32>
    %70 = vector.shape_cast %69 : vector<1x8x256xf32> to vector<8x256xf32>
    %cst_26 = arith.constant dense<0.000000e+00> : vector<8x8xf32>
    %71 = tpu.matmul %68, %70, %cst_26 {dimension_numbers = #tpu.dot_dimension_numbers<[1], [1], [0], [0], [0, 0, 1, 0], [], []>} : vector<8x256xf32>, vector<8x256xf32>, vector<8x8xf32> -> vector<8x8xf32>
    %72 = vector.extract_strided_slice %54 {offsets = [1, 0, 0], sizes = [1, 8, 256], strides = [1, 1, 1]} : vector<2x8x256xf32> to vector<1x8x256xf32>
    %73 = vector.shape_cast %72 : vector<1x8x256xf32> to vector<8x256xf32>
    %cst_27 = arith.constant dense<0.000000e+00> : vector<8x256xf32>
    %74 = tpu.matmul %71, %73, %cst_27 {dimension_numbers = #tpu.dot_dimension_numbers<[1], [0], [0], [1], [0, 0, 1, 1], [], []>} : vector<8x8xf32>, vector<8x256xf32>, vector<8x256xf32> -> vector<8x256xf32>
    %75 = vector.extract_strided_slice %74 {offsets = [0, 0], sizes = [4, 256], strides = [1, 1]} : vector<8x256xf32> to vector<4x256xf32>
    %c1 = arith.constant 1 : index
    %c0_28 = arith.constant 0 : index
    %c0_29 = arith.constant 0 : index
    %76 = vector.load %arg4[%c1, %c0_28, %c0_29] : memref<2x4x256xf32, #tpu.memory_space<vmem>>, vector<1x4x256xf32>
    %77 = vector.shape_cast %76 : vector<1x4x256xf32> to vector<4x256xf32>
    %78 = vector.shape_cast %75 : vector<4x256xf32> to vector<1x4x256xf32>
    tpu.vector_store %arg4[%c1, %c0_28, %c0_29], %78 {strides = array<i32>} : memref<2x4x256xf32, #tpu.memory_space<vmem>>, vector<1x4x256xf32>,
    return
  }
  func.func @transform_0(%arg0: i32) -> (i32, i32, i32) {
    %c0_i32 = arith.constant 0 : i32
    %c0_i32_0 = arith.constant 0 : i32
    %c0_i32_1 = arith.constant 0 : i32
    return %arg0, %c0_i32, %c0_i32_0 : i32, i32, i32
  }
  func.func @transform_1(%arg0: i32) -> (i32, i32) {
    %c0_i32 = arith.constant 0 : i32
    %c0_i32_0 = arith.constant 0 : i32
    %c0_i32_1 = arith.constant 0 : i32
    return %c0_i32, %c0_i32_0 : i32, i32
  }
  func.func @transform_2(%arg0: i32) -> (i32, i32) {
    %c0_i32 = arith.constant 0 : i32
    %c0_i32_0 = arith.constant 0 : i32
    %c0_i32_1 = arith.constant 0 : i32
    return %c0_i32, %c0_i32_0 : i32, i32
  }
  func.func @transform_3(%arg0: i32) -> (i32, i32, i32) {
    %c0_i32 = arith.constant 0 : i32
    %c0_i32_0 = arith.constant 0 : i32
    %c0_i32_1 = arith.constant 0 : i32
    return %arg0, %c0_i32, %c0_i32_0 : i32, i32, i32
  }
}

</mosaic_0001>

<bundles_post_ra>
// kernel: tpu_custom_call.1
= control target key start
LH: loop header
LB: loop body
LE: loop exit
PB: predicated region body
PF: predicated region fallthrough
CT: control target
= control target key end

     0   :  { %vm34_vm0 = vcmask 1043456   ;;  %v726_v4 = vmov 0.0   ;;  %s814_s0 = inlined_call_operand.vmem [shape: f32[2,4,256], index: 0, kind: input, shape index: {}]   ;;  %s815_s1 = inlined_call_operand.vmem [shape: f32[24,4], index: 1, kind: input, shape index: {}]   ;;  %s816_s2 = inlined_call_operand.vmem [shape: f32[24,1], index: 2, kind: input, shape index: {}]   ;;  %s817_s3 = inlined_call_operand.hbm [shape: f32[2,4,256], index: 3, kind: output, shape index: {}]  }
   0x1   :  { %v21_v0 = vld [vmem:[%s814_s0] sm:$0xff]  ;;  %v657_v1 = vld [vmem:[%s814_s0 + $0x8] sm:$0xff]  ;;  %103 = vmatprep.mubr.f32.mxu0 %v726_v4  ;;  %200 = vmatprep.mubr.f32.mxu1 %v726_v4 }
   0x2   :  { %v23_v2 = vcombine.high %v21_v0, %v21_v0  ;;  %v131_v3 = vcombine.high %v657_v1, %v657_v1 }
   0x3   :  { %8 = vsyncpa [#allocation4], 0  ;;  %v15_v5 = vld [vmem:[%s815_s1] sm:$0xff]  ;;  %vm24_vm1 = vcmask 31744   ;;  %v727_v6 = vmov 0   ;;  %v19_v7 = vld [vmem:[%s816_s2 + $0x8] sm:$0xff] }
   0x4   :  { %674 = vset.pattern.permute.xlu0 %v727_v6  ;;  %675 = vset.pattern.permute.xlu1 %v727_v6  ;;  %v16_v8 = vld [vmem:[%s815_s1 + $0x8] sm:$0xff]  ;;  %v17_v9 = vld [vmem:[%s815_s1 + $0x10] sm:$0xff]  ;;  %v18_v41 = vld [vmem:[%s816_s2] sm:$0xff]  ;;  %vm406_vm3 = vcmask 64512  }
   0x5   :  { %652 = vmatprep.subr.msk.mxu0 %vm34_vm0, %v23_v2  ;;  %658 = vmatprep.subr.msk.mxu1 %vm34_vm0, %v131_v3  ;;  %v20_v42 = vld [vmem:[%s816_s2 + $0x10] sm:$0xff]  ;;  %s728_s2 = smov [#allocation3]  }
   0x6   :  { %653 = vmatpush1.msk.msra.mxu0 %vm34_vm0, %v21_v0  ;;  %659 = vmatpush1.msk.msra.mxu1 %vm34_vm0, %v657_v1  ;;  %s641_s26 = sshll.u32 %s728_s2, 4  ;;  %s642_s26 = int_to_ptr.vmem [resolvable:$true] %s641_s26 }
   0x7   :  { %654 = vmatmul.mubr.msk.f32.vlgmr.msra.gmra.mrb[0].mxu0 %vm24_vm1, %v15_v5  ;;  %660 = vmatmul.mubr.msk.f32.vlgmr.msra.gmra.mrb[0].mxu1 %vm24_vm1, %v15_v5  ;;  %s702_s27 = scalar_lea.vmem %s642_s26, 256  ;;  %p707_p1 = scmp.lt.s32.totalorder %s642_s26, %s642_s26 }
   0x8   :  { %109 = vmatprep.mubr.f32.mxu0 %v726_v4  ;;  %206 = vmatprep.mubr.f32.mxu1 %v726_v4  ;;  %p703_p0 = scmp.ne.s32.totalorder %s642_s26, %s702_s27  ;;  %p708_p2 = scmp.lt.s32.totalorder %s702_s27, %s702_s27 }
   0x9   :  { %245 = vperm.xlu0 %674, %v19_v7  }
   0xa   :  { %p709_p3 = por %p708_p2, %p707_p1 }
   0xb   :  { %655 = vmatmul.mubr.msk.f32.gmra.mrb[2].mxu0 %vm24_vm1, %v16_v8  ;;  %661 = vmatmul.mubr.msk.f32.gmra.mrb[2].mxu1 %vm24_vm1, %v16_v8 }
   0xc   :  { %115 = vmatprep.mubr.f32.mxu0 %v726_v4  ;;  %212 = vmatprep.mubr.f32.mxu1 %v726_v4  ;;  %p710_p4 = pnand %p709_p3, %p703_p0 }
   0xf   :  { %656 = vmatmul.mubr.msk.f32.gmra.mrb[4].mxu0 %vm24_vm1, %v17_v9  ;;  %662 = vmatmul.mubr.msk.f32.gmra.mrb[4].mxu1 %vm24_vm1, %v17_v9 }
  0x10   :  { %474 = vmatprep.mubr.f32.mxu1 %v726_v4 }
  0x88   :  { %v246_v14 = vpop.permute.xlu0 %245 }
  0xda   :  { %v786_v10 = vpop.f32.mrb[0].mxu0  ;;  %v788_v11 = vpop.f32.mrb[0].mxu1 }
  0xdb   :  { %v107_v12 = vpop.f32.mrb[1].mxu0  ;;  %v790_v13 = vpop.f32.mrb[1].mxu1 }
  0xde   :  { %v111_v15 = vpop.f32.mrb[2].mxu0  ;;  %v208_v16 = vpop.f32.mrb[2].mxu1 }
  0xdf   :  { %v255_v17 = vadd.f32 %v246_v14, %v111_v15  ;;  %v261_v18 = vadd.f32 %v246_v14, %v208_v16  ;;  %v113_v19 = vpop.f32.mrb[3].mxu0  ;;  %v210_v20 = vpop.f32.mrb[3].mxu1 }
  0xe0   :  { %v256_v21 = vadd.f32 %v246_v14, %v113_v19  ;;  %v262_v22 = vadd.f32 %v246_v14, %v210_v20 }
  0xe2   :  { %v268_v23 = vmax.f32 %v261_v18, %v262_v22  ;;  %v265_v24 = vmax.f32 %v255_v17, %v256_v21  ;;  %v117_v43 = vpop.f32.mrb[4].mxu0  ;;  %v214_v45 = vpop.f32.mrb[4].mxu1 }
  0xe3   :  { %v119_v44 = vpop.f32.mrb[5].mxu0  ;;  %v216_v46 = vpop.f32.mrb[5].mxu1 }
  0xe4   :  { %269 = vmax.xlane.f32.xlu1 %v268_v23  ;;  %266 = vmax.xlane.f32.xlu0 %v265_v24 }
 0x171   :  { %v270_v25 = vpop.xlane.xlu1 %269  ;;  %v267_v26 = vpop.xlane.xlu0 %266 }
 0x172   :  { %v273_v27 = vsub.f32 %v261_v18, %v270_v25  ;;  %v271_v28 = vsub.f32 %v255_v17, %v267_v26  ;;  %v272_v29 = vsub.f32 %v256_v21, %v267_v26  ;;  %v274_v30 = vsub.f32 %v262_v22, %v270_v25 }
 0x174   :  { %v275_v31 = vmul.f32 1.442695, %v271_v28  ;;  %v277_v32 = vmul.f32 1.442695, %v272_v29  ;;  %v279_v33 = vmul.f32 1.442695, %v273_v27  ;;  %v327_v27 = vlaneseq }
 0x175   :  { %v281_v34 = vmul.f32 1.442695, %v274_v30 }
 0x176   :  { %678 = vpow2.f32 %v275_v31  ;;  %v328_v29 = vshrl.u32 %v327_v27, 7 }
 0x177   :  { %680 = vpow2.f32 %v277_v32 }
 0x178   :  { %682 = vpow2.f32 %v279_v33  ;;  %vm329_vm2 = vcmp.lt.s32.totalorder %v328_v29, 4 }
 0x179   :  { %684 = vpow2.f32 %v281_v34 }
 0x180   :  { %v679_v35 = vpop.eup %678 }
 0x181   :  { %v681_v36 = vpop.eup %680 }
 0x182   :  { %v683_v37 = vpop.eup %682  ;;  %v283_v38 = vadd.f32 %v681_v36, %v679_v35 }
 0x183   :  { %v685_v39 = vpop.eup %684 }
 0x184   :  { %284 = vadd.xlane.f32.xlu1 %v283_v38  ;;  %v286_v40 = vadd.f32 %v685_v39, %v683_v37 }
 0x188   :  { %287 = vadd.xlane.f32.xlu1 %v286_v40 }
 0x199   :  { %240 = vperm.xlu1 %675, %v18_v41  }
 0x19d   :  { %250 = vperm.xlu1 %675, %v20_v42  }
 0x211   :  { %v285_v47 = vpop.xlane.xlu1 %284 }
 0x212   :  { %686 = vrcp.f32 %v285_v47 }
 0x215   :  { %v288_v48 = vpop.xlane.xlu1 %287 }
 0x216   :  { %688 = vrcp.f32 %v288_v48 }
 0x219   :  { %v241_v49 = vpop.permute.xlu1 %240 }
 0x21a   :  { %v254_v50 = vadd.f32 %v241_v49, %v107_v12  ;;  %v253_v1 = vadd.f32 %v241_v49, %v786_v10  ;;  %v260_v3 = vadd.f32 %v241_v49, %v790_v13  ;;  %v259_v5 = vadd.f32 %v241_v49, %v788_v11 }
 0x21c   :  { %v687_v51 = vpop.eup %686  ;;  %400 = vmatprep.mubr.f32.mxu0 %v254_v50 }
 0x21d   :  { %v291_v52 = vmul.f32 0.00390625, %v687_v51  ;;  %v251_v53 = vpop.permute.xlu1 %250 }
 0x21e   :  { %v263_v54 = vadd.f32 %v251_v53, %v214_v45  ;;  %v264_v55 = vadd.f32 %v251_v53, %v216_v46  ;;  %v257_v56 = vadd.f32 %v251_v53, %v117_v43  ;;  %v258_v57 = vadd.f32 %v251_v53, %v119_v44 }
 0x21f   :  { %v293_v58 = vmul.f32 %v679_v35, %v291_v52  ;;  %v294_v59 = vmul.f32 %v681_v36, %v291_v52 }
 0x220   :  { %v689_v60 = vpop.eup %688  ;;  %v300_v61 = vmax.f32 %v263_v54, %v264_v55  ;;  %v297_v62 = vmax.f32 %v257_v56, %v258_v57 }
 0x221   :  { %v292_v63 = vmul.f32 0.00390625, %v689_v60  ;;  %336 = vmatprep.subr.mxu0 %v294_v59 }
 0x222   :  { %337 = vmatpush1.xpose.msra.mxu0 %v293_v58  ;;  %301 = vmax.xlane.f32.xlu0 %v300_v61 }
 0x223   :  { %v295_v0 = vmul.f32 %v683_v37, %v292_v63  ;;  %298 = vmax.xlane.f32.xlu1 %v297_v62  ;;  %v296_v2 = vmul.f32 %v685_v39, %v292_v63 }
 0x225   :  { %401 = vmatmul.mubr.f32.vlgmr.msra.gmra.mrb[6].mxu0 %v253_v1  ;;  %486 = vmatprep.subr.mxu0 %v296_v2 }
 0x226   :  { %487 = vmatpush1.xpose.msra.mxu0 %v295_v0  ;;  %550 = vmatprep.mubr.f32.mxu0 %v260_v3 }
 0x229   :  { %551 = vmatmul.mubr.f32.vlgmr.msra.gmra.mrb[8].mxu0 %v259_v5 }
 0x2af   :  { %v302_v6 = vpop.xlane.xlu0 %301 }
 0x2b0   :  { %v305_v7 = vsub.f32 %v263_v54, %v302_v6  ;;  %v299_v8 = vpop.xlane.xlu1 %298  ;;  %v306_v9 = vsub.f32 %v264_v55, %v302_v6 }
 0x2b1   :  { %v303_v12 = vsub.f32 %v257_v56, %v299_v8  ;;  %v304_v14 = vsub.f32 %v258_v57, %v299_v8 }
 0x2b2   :  { %v311_v10 = vmul.f32 1.442695, %v305_v7  ;;  %v313_v17 = vmul.f32 1.442695, %v306_v9 }
 0x2b3   :  { %v307_v15 = vmul.f32 1.442695, %v303_v12  ;;  %v309_v16 = vmul.f32 1.442695, %v304_v14 }
 0x2b5   :  { %690 = vpow2.f32 %v307_v15 }
 0x2b6   :  { %692 = vpow2.f32 %v309_v16 }
 0x2b7   :  { %694 = vpow2.f32 %v311_v10 }
 0x2b8   :  { %696 = vpow2.f32 %v313_v17 }
 0x2bf   :  { %v691_v13 = vpop.eup %690 }
 0x2c0   :  { %v693_v18 = vpop.eup %692 }
 0x2c1   :  { %v695_v19 = vpop.eup %694  ;;  %v315_v20 = vadd.f32 %v693_v18, %v691_v13 }
 0x2c2   :  { %v697_v11 = vpop.eup %696 }
 0x2c3   :  { %316 = vadd.xlane.f32.xlu0 %v315_v20  ;;  %v318_v21 = vadd.f32 %v697_v11, %v695_v19 }
 0x2c7   :  { %319 = vadd.xlane.f32.xlu0 %v318_v21 }
 0x2f8   :  { %v402_v22 = vpop.f32.mrb[6].mxu0 }
 0x2f9   :  { %v404_v23 = vpop.f32.mrb[7].mxu0 }
 0x2fc   :  { %v552_v24 = vpop.f32.mrb[8].mxu0 }
 0x2fd   :  { %v554_v25 = vpop.f32.mrb[9].mxu0 }
 0x350   :  { %v317_v26 = vpop.xlane.xlu0 %316 }
 0x351   :  { %698 = vrcp.f32 %v317_v26 }
 0x354   :  { %v320_v28 = vpop.xlane.xlu0 %319 }
 0x355   :  { %700 = vrcp.f32 %v320_v28 }
 0x35b   :  { %v699_v30 = vpop.eup %698 }
 0x35c   :  { %v323_v31 = vmul.f32 %v699_v30, %v691_v13  ;;  %v324_v32 = vmul.f32 %v699_v30, %v693_v18 }
 0x35e   :  { %663 = vmatprep.subr.msk.mxu1 %vm329_vm2, %v324_v32 }
 0x35f   :  { %v701_v33 = vpop.eup %700  ;;  %664 = vmatpush1.msk.msra.mxu1 %vm329_vm2, %v323_v31 }
 0x360   :  { %v325_v34 = vmul.f32 %v701_v33, %v695_v19  ;;  %665 = vmatmul.mubr.msk.f32.vlgmr.msra.gmra.mrb[6].mxu1 %vm406_vm3, %v402_v22  ;;  %v326_v35 = vmul.f32 %v701_v33, %v697_v11 }
 0x361   :  { %623 = vmatprep.mubr.f32.mxu1 %v726_v4 }
 0x362   :  { %666 = vmatprep.subr.msk.mxu1 %vm329_vm2, %v326_v35 }
 0x363   :  { %667 = vmatpush1.msk.msra.mxu1 %vm329_vm2, %v325_v34 }
 0x364   :  { %668 = vmatmul.mubr.msk.f32.vlgmr.msra.gmra.mrb[8].mxu1 %vm406_vm3, %v552_v24 }
 0x433   :  { %v476_v36 = vpop.f32.mrb[6].mxu1 }
 0x434   :  { %v478_v37 = vpop.f32.mrb[7].mxu1 }
 0x435   :  { %v483_v38 = vcombine.low %v476_v36, %v478_v37 }
 0x437   :  { %485 = vst [vmem:[#allocation3] sm:$0xff] %v483_v38  ;;  %v625_v39 = vpop.f32.mrb[8].mxu1 }
 0x438   :  { %v627_v40 = vpop.f32.mrb[9].mxu1 }
 0x439   :  { %v632_v41 = vcombine.low %v625_v39, %v627_v40 }
 0x43b   :  { %635 = vst [vmem:[#allocation3 + $0x8] sm:$0xff] %v632_v41 }
 0x43c   :  { %713 = shalt.err (!%p710_p4)
}
 0x43d   :  { %s714_s30 = scalar_lea.hbm %s817_s3, 256 }
 0x43e   :  { %p715_p5 = scmp.ne.s32.totalorder %s817_s3, %s714_s30  ;;  %p718_p6 = scmp.lt.u32.totalorder %s714_s30, %s817_s3 }
 0x440   :  { %p720_p7 = pnand %p718_p6, %p715_p5 }
 0x442   :  { %723 = shalt.err (!%p720_p7)
}
 0x443   :  { %s729_s8 = smov 128   ;;  %s730_s9 = smov 8  }
 0x444   :  { %647 = dma.vmem_to_hbm [thread:$0]  %s642_s26, 256, %s817_s3, [#allocation4], %s729_s8, %s729_s8, %s730_s9  }
 0x445   :  { %724 = dma.done.wait [#allocation4], 256  }
 0x446   :  { %725 = vsyncadd [#allocation4], 4294967040 }
 0x447   :  { %651 = vsyncpa [#allocation4], 1 }

</bundles_post_ra>
